<compile_context>
chip_gen: v7x
topology: tpu7x:2x2x1
jax: 0.10.0
libtpu: 0.0.40
codegen_flags: <defaults>
</compile_context>

<pallas_src>
import functools
import math

import jax
import jax.numpy as jnp
from jax.experimental import pallas as pl
from jax.experimental.pallas import tpu as pltpu

FB_LIMITS = (100.0, 4000.0)
HFS_FC_LIMITS = (16000.0, 22000.0)
LFS_FC_LIMITS = (20.0, 200.0)


def _gelu_exact(x):
    # matches torch.nn.GELU() with approximate='none'
    return 0.5 * x * (1.0 + jax.lax.erf(x * (1.0 / math.sqrt(2.0))))


def _round_up(n, m):
    return ((n + m - 1) // m) * m


def _pad_to(a, shape):
    return jnp.pad(a, [(0, t - s) for s, t in zip(a.shape, shape)])


def _niirf_kernel(x_ref, bdup_ref, phase_ref, w_ref, b_ref, wout_ref, bout_ref,
                  pass_ref, scale_ref, low_ref, out_ref, *, hidden_layers):
    # x_ref: (tb, 2) = [phis - pi, thetas]
    x = x_ref[...]

    # K=2 contraction as two VPU broadcast-FMAs; +pi/2 phase on the duplicated second
    # half makes sin(proj + phase) == concat(sin(proj), cos(proj)).
    proj = (x[:, 0:1] * bdup_ref[0:1, :]
            + x[:, 1:2] * bdup_ref[1:2, :]
            + phase_ref[...])                          # (tb, H_pad)
    emb = jnp.sin(proj)                                # (tb, H_pad)

    # MLP stack: Linear -> GELU (dropout is identity at inference)
    for l in range(hidden_layers):
        h = jnp.dot(emb, w_ref[l], preferred_element_type=jnp.float32) + b_ref[l]
        emb = _gelu_exact(h)

    est = jnp.dot(emb, wout_ref[...],
                  preferred_element_type=jnp.float32) + bout_ref[...]   # (tb, F_pad)

    # Fused column-wise epilogue over the lane-dense slab:
    #   gain cols: pass=1, scale=0, low=0          -> est (raw)
    #   fc   cols: pass=0, scale=fc_width, low=fc_low
    #   fb   cols: pass=0, scale=fb_width, low=fb_low
    #   pad  cols: all zero                        -> 0
    sig = jax.nn.sigmoid(est)
    out_ref[...] = pass_ref[...] * est + scale_ref[...] * sig + low_ref[...]


def single_subject_niirf(phis, thetas, params, *, n_peaks, hidden_layers,
                         max_batch_block=512):
    bs = phis.shape[0]
    H = params["bmat"].shape[0] * 2
    L = hidden_layers
    p2 = n_peaks + 2
    half = 3 * n_peaks + 4
    F = 2 * half
    H_pad = _round_up(H, 128)
    F_pad = _round_up(F, 128)

    # glue: stack inputs and shift phis by pi (matches torch.stack([phis - pi, thetas], -1))
    x = jnp.stack([phis - math.pi, thetas], axis=-1).astype(jnp.float32)   # (bs, 2)

    # Batch tiling: sublane-aligned tile, pad batch so the grid divides evenly.
    tb = min(_round_up(bs, 8), max_batch_block)
    bs_pad = _round_up(bs, tb)
    if bs_pad != bs:
        x = jnp.pad(x, ((0, bs_pad - bs), (0, 0)))
    grid = (bs_pad // tb,)

    # Duplicated basis (2, H) + phase vector; zero-pad H/F to lane-dense widths.
    bt = params["bmat"].T.astype(jnp.float32)                              # (2, H/2)
    bdup = _pad_to(jnp.concatenate([bt, bt], axis=-1), (2, H_pad))         # (2, H_pad)
    phase = jnp.zeros((1, H_pad), jnp.float32).at[0, H // 2:H].set(0.5 * math.pi)
    w = _pad_to(params["mlp_w_t"].astype(jnp.float32), (L, H_pad, H_pad))  # (L, Hp, Hp)
    b = _pad_to(params["mlp_b"].astype(jnp.float32)[:, None, :], (L, 1, H_pad))
    wout = _pad_to(params["out_w_t"].astype(jnp.float32), (H_pad, F_pad))  # (Hp, Fp)
    bout = _pad_to(params["out_b"].astype(jnp.float32)[None, :], (1, F_pad))

    # Full-width epilogue vectors (built per-half, tiled for the 2 "rows", padded).
    fb_low = float(FB_LIMITS[0])
    fb_width = float(FB_LIMITS[1] - FB_LIMITS[0])
    fc_low = params["fc_low"].astype(jnp.float32)
    fc_width = params["fc_width"].astype(jnp.float32)
    pass_half = jnp.concatenate([jnp.ones((p2,), jnp.float32),
                                 jnp.zeros((p2,), jnp.float32),
                                 jnp.zeros((n_peaks,), jnp.float32)])
    scale_half = jnp.concatenate([jnp.zeros((p2,), jnp.float32),
                                  fc_width,
                                  jnp.full((n_peaks,), fb_width, jnp.float32)])
    low_half = jnp.concatenate([jnp.zeros((p2,), jnp.float32),
                                fc_low,
                                jnp.full((n_peaks,), fb_low, jnp.float32)])
    pass_vec = _pad_to(jnp.tile(pass_half, 2)[None, :], (1, F_pad))
    scale_vec = _pad_to(jnp.tile(scale_half, 2)[None, :], (1, F_pad))
    low_vec = _pad_to(jnp.tile(low_half, 2)[None, :], (1, F_pad))

    inputs = (x, bdup, phase, w, b, wout, bout, pass_vec, scale_vec, low_vec)

    def const_spec(shape):
        nd = len(shape)
        return pl.BlockSpec(shape, lambda i, _n=nd: (0,) * _n)

    in_specs = [pl.BlockSpec((tb, 2), lambda i: (i, 0))]
    in_specs += [const_spec(a.shape) for a in inputs[1:]]
    out_spec = pl.BlockSpec((tb, F_pad), lambda i: (i, 0))
    out_shape = jax.ShapeDtypeStruct((bs_pad, F_pad), jnp.float32)

    kernel = functools.partial(_niirf_kernel, hidden_layers=hidden_layers)

    # Advisory cost hint so XLA schedules neighbors sensibly around the custom call.
    flops = int(bs_pad * (4 * H_pad + 2 * L * H_pad * H_pad + 2 * H_pad * F_pad + 4 * F_pad))
    transc = int(bs_pad * (H_pad + L * H_pad + F_pad))
    bytes_acc = int(4 * (x.size + bdup.size + phase.size + w.size + b.size
                         + wout.size + bout.size + 3 * F_pad + bs_pad * F_pad))

    est = pl.pallas_call(
        kernel,
        out_shape=out_shape,
        grid=grid,
        in_specs=in_specs,
        out_specs=out_spec,
        compiler_params=pltpu.CompilerParams(dimension_semantics=("parallel",)),
        cost_estimate=pl.CostEstimate(flops=flops, transcendentals=transc,
                                      bytes_accessed=bytes_acc),
    )(*inputs)

    # Un-pad, reshape, split in the wrapper (keeps the kernel output lane-dense).
    est = est[:bs, :F].reshape(bs, 2, half)
    gain = est[..., :p2]
    fc = est[..., p2:2 * p2]
    fb = est[..., 2 * p2:]
    return gain, fc, fb


def init_params(key, *, fc_limits, hidden_features, hidden_layers, scale=1.0):
    n_peaks = len(fc_limits)
    out_features = (3 * n_peaks + 4) * 2
    H = hidden_features
    ks = jax.random.split(key, 2 * hidden_layers + 3)
    bmat = scale * jax.random.normal(ks[0], (H // 2, 2), jnp.float32)
    mlp_w_t, mlp_b = [], []
    for l in range(hidden_layers):
        w = jax.random.normal(ks[1 + 2 * l], (H, H), jnp.float32) / math.sqrt(H)
        bvec = jax.random.normal(ks[2 + 2 * l], (H,), jnp.float32) * 0.01
        mlp_w_t.append(w.T)
        mlp_b.append(bvec)
    out_w = jax.random.normal(ks[-2], (out_features, H), jnp.float32) / math.sqrt(H)
    out_b = jax.random.normal(ks[-1], (out_features,), jnp.float32) * 0.01
    fc_low = jnp.array([LFS_FC_LIMITS[0]] + [x[0] for x in fc_limits] + [HFS_FC_LIMITS[0]],
                       jnp.float32)
    fc_width = jnp.array([LFS_FC_LIMITS[1] - LFS_FC_LIMITS[0]]
                         + [x[1] - x[0] for x in fc_limits]
                         + [HFS_FC_LIMITS[1] - HFS_FC_LIMITS[0]], jnp.float32)
    return {
        "bmat": bmat,
        "mlp_w_t": jnp.stack(mlp_w_t, 0),
        "mlp_b": jnp.stack(mlp_b, 0),
        "out_w_t": out_w.T,
        "out_b": out_b,
        "fc_low": fc_low,
        "fc_width": fc_width,
    }


def reference(phis, thetas, params, *, n_peaks, hidden_layers):
    bs = phis.shape[0]
    x = jnp.stack([phis - math.pi, thetas], -1)
    emb = x @ params["bmat"].T
    emb = jnp.concatenate([jnp.sin(emb), jnp.cos(emb)], -1)
    for l in range(hidden_layers):
        emb = _gelu_exact(emb @ params["mlp_w_t"][l] + params["mlp_b"][l])
    est = (emb @ params["out_w_t"] + params["out_b"]).reshape(bs, 2, -1)
    p2 = n_peaks + 2
    gain = est[..., :p2]
    fc = est[..., p2:2 * p2]
    fb = est[..., 2 * p2:]
    fc = params["fc_width"][None, None, :] * jax.nn.sigmoid(fc) + params["fc_low"][None, None, :]
    fb = (FB_LIMITS[1] - FB_LIMITS[0]) * jax.nn.sigmoid(fb) + FB_LIMITS[0]
    return gain, fc, fb


def _check(phis, thetas, params, n_peaks, hidden_layers, max_batch_block):
    gain, fc, fb = single_subject_niirf(phis, thetas, params, n_peaks=n_peaks,
                                        hidden_layers=hidden_layers,
                                        max_batch_block=max_batch_block)
    jax.block_until_ready((gain, fc, fb))
    g_ref, fc_ref, fb_ref = reference(phis, thetas, params,
                                      n_peaks=n_peaks, hidden_layers=hidden_layers)
    bs = phis.shape[0]
    assert gain.shape == (bs, 2, n_peaks + 2)
    assert fc.shape == (bs, 2, n_peaks + 2)
    assert fb.shape == (bs, 2, n_peaks)
    assert jnp.allclose(gain, g_ref, rtol=1e-5, atol=1e-4), "gain mismatch"
    assert jnp.allclose(fc, fc_ref, rtol=1e-5, atol=1e-2), "fc mismatch"
    assert jnp.allclose(fb, fb_ref, rtol=1e-5, atol=1e-2), "fb mismatch"


if __name__ == "__main__":
    # small config consistent with the module: 2 peaks, hidden=32 (even), 1 hidden layer
    fc_limits = ((500.0, 1000.0), (1000.0, 2000.0))
    n_peaks = len(fc_limits)
    hidden_features = 32
    hidden_layers = 1

    key = jax.random.PRNGKey(0)
    kp, ka, kb, kc, kd = jax.random.split(key, 5)
    params = init_params(kp, fc_limits=fc_limits, hidden_features=hidden_features,
                         hidden_layers=hidden_layers, scale=1.0)

    # main check: bs=8 (single grid step, full-array blocks)
    phis = jax.random.uniform(ka, (8,), jnp.float32, 0.0, 2.0 * math.pi)
    thetas = jax.random.uniform(kb, (8,), jnp.float32, 0.0, math.pi)
    _check(phis, thetas, params, n_peaks, hidden_layers, max_batch_block=512)

    # secondary check: ragged batch exercising the tiled + padded grid path
    phis2 = jax.random.uniform(kc, (37,), jnp.float32, 0.0, 2.0 * math.pi)
    thetas2 = jax.random.uniform(kd, (37,), jnp.float32, 0.0, math.pi)
    _check(phis2, thetas2, params, n_peaks, hidden_layers, max_batch_block=16)

    print("KERNEL_OK")
</pallas_src>

<mosaic_0001>
module attributes {stable_mosaic.version = 11 : i64} {
  func.func @_niirf_kernel(%arg0: i32, %arg1: memref<8x2xf32, #tpu.memory_space<vmem>>, %arg2: memref<2x128xf32, #tpu.memory_space<vmem>>, %arg3: memref<1x128xf32, #tpu.memory_space<vmem>>, %arg4: memref<1x128x128xf32, #tpu.memory_space<vmem>>, %arg5: memref<1x1x128xf32, #tpu.memory_space<vmem>>, %arg6: memref<128x128xf32, #tpu.memory_space<vmem>>, %arg7: memref<1x128xf32, #tpu.memory_space<vmem>>, %arg8: memref<1x128xf32, #tpu.memory_space<vmem>>, %arg9: memref<1x128xf32, #tpu.memory_space<vmem>>, %arg10: memref<1x128xf32, #tpu.memory_space<vmem>>, %arg11: memref<8x128xf32, #tpu.memory_space<vmem>>) attributes {dimension_semantics = [#tpu.dimension_semantics<parallel>], iteration_bounds = array<i64: 1>, scalar_prefetch = 0 : i64, scratch_operands = 0 : i64, tpu.core_type = #tpu.core_type<tc>, window_params = [{transform_indices = @transform_0, window_bounds = array<i64: 8, 2>}, {pipeline_mode = #tpu.pipeline_mode<synchronous>, transform_indices = @transform_1, window_bounds = array<i64: 2, 128>}, {pipeline_mode = #tpu.pipeline_mode<synchronous>, transform_indices = @transform_2, window_bounds = array<i64: 1, 128>}, {pipeline_mode = #tpu.pipeline_mode<synchronous>, transform_indices = @transform_3, window_bounds = array<i64: 1, 128, 128>}, {pipeline_mode = #tpu.pipeline_mode<synchronous>, transform_indices = @transform_4, window_bounds = array<i64: 1, 1, 128>}, {pipeline_mode = #tpu.pipeline_mode<synchronous>, transform_indices = @transform_5, window_bounds = array<i64: 128, 128>}, {pipeline_mode = #tpu.pipeline_mode<synchronous>, transform_indices = @transform_6, window_bounds = array<i64: 1, 128>}, {pipeline_mode = #tpu.pipeline_mode<synchronous>, transform_indices = @transform_7, window_bounds = array<i64: 1, 128>}, {pipeline_mode = #tpu.pipeline_mode<synchronous>, transform_indices = @transform_8, window_bounds = array<i64: 1, 128>}, {pipeline_mode = #tpu.pipeline_mode<synchronous>, transform_indices = @transform_9, window_bounds = array<i64: 1, 128>}, {transform_indices = @transform_10, window_bounds = array<i64: 8, 128>}]} {
    %c0 = arith.constant 0 : index
    %c0_0 = arith.constant 0 : index
    %0 = vector.load %arg1[%c0, %c0_0] : memref<8x2xf32, #tpu.memory_space<vmem>>, vector<8x2xf32>
    %1 = vector.extract_strided_slice %0 {offsets = [0, 0], sizes = [8, 1], strides = [1, 1]} : vector<8x2xf32> to vector<8x1xf32>
    %c0_1 = arith.constant 0 : index
    %c0_2 = arith.constant 0 : index
    %2 = vector.load %arg2[%c0_1, %c0_2] : memref<2x128xf32, #tpu.memory_space<vmem>>, vector<1x128xf32>
    %3 = vector.broadcast %1 : vector<8x1xf32> to vector<8x128xf32>
    %4 = vector.broadcast %2 : vector<1x128xf32> to vector<8x128xf32>
    %5 = arith.mulf %3, %4 : vector<8x128xf32>
    %6 = vector.extract_strided_slice %0 {offsets = [0, 1], sizes = [8, 1], strides = [1, 1]} : vector<8x2xf32> to vector<8x1xf32>
    %c1 = arith.constant 1 : index
    %c0_3 = arith.constant 0 : index
    %7 = vector.load %arg2[%c1, %c0_3] : memref<2x128xf32, #tpu.memory_space<vmem>>, vector<1x128xf32>
    %8 = vector.broadcast %6 : vector<8x1xf32> to vector<8x128xf32>
    %9 = vector.broadcast %7 : vector<1x128xf32> to vector<8x128xf32>
    %10 = arith.mulf %8, %9 : vector<8x128xf32>
    %11 = arith.addf %5, %10 : vector<8x128xf32>
    %c0_4 = arith.constant 0 : index
    %c0_5 = arith.constant 0 : index
    %12 = vector.load %arg3[%c0_4, %c0_5] : memref<1x128xf32, #tpu.memory_space<vmem>>, vector<1x128xf32>
    %13 = vector.broadcast %12 : vector<1x128xf32> to vector<8x128xf32>
    %14 = arith.addf %11, %13 : vector<8x128xf32>
    %15 = math.sin %14 : vector<8x128xf32>
    %c0_6 = arith.constant 0 : index
    %c0_7 = arith.constant 0 : index
    %c0_8 = arith.constant 0 : index
    %16 = vector.load %arg4[%c0_6, %c0_7, %c0_8] : memref<1x128x128xf32, #tpu.memory_space<vmem>>, vector<1x128x128xf32>
    %17 = vector.shape_cast %16 : vector<1x128x128xf32> to vector<128x128xf32>
    %cst = arith.constant dense<0.000000e+00> : vector<8x128xf32>
    %18 = tpu.matmul %15, %17, %cst {dimension_numbers = #tpu.dot_dimension_numbers<[1], [0], [0], [1], [0, 0, 1, 1], [], []>} : vector<8x128xf32>, vector<128x128xf32>, vector<8x128xf32> -> vector<8x128xf32>
    %c0_9 = arith.constant 0 : index
    %c0_10 = arith.constant 0 : index
    %c0_11 = arith.constant 0 : index
    %19 = vector.load %arg5[%c0_9, %c0_10, %c0_11] : memref<1x1x128xf32, #tpu.memory_space<vmem>>, vector<1x1x128xf32>
    %20 = vector.shape_cast %19 : vector<1x1x128xf32> to vector<1x128xf32>
    %21 = vector.broadcast %20 : vector<1x128xf32> to vector<8x128xf32>
    %22 = arith.addf %18, %21 : vector<8x128xf32>
    %cst_12 = arith.constant 5.000000e-01 : f32
    %23 = vector.broadcast %cst_12 : f32 to vector<8x128xf32>
    %24 = arith.mulf %23, %22 : vector<8x128xf32>
    %cst_13 = arith.constant 0.707106769 : f32
    %25 = vector.broadcast %cst_13 : f32 to vector<8x128xf32>
    %26 = arith.mulf %22, %25 : vector<8x128xf32>
    %27 = math.erf %26 : vector<8x128xf32>
    %cst_14 = arith.constant 1.000000e+00 : f32
    %28 = vector.broadcast %cst_14 : f32 to vector<8x128xf32>
    %29 = arith.addf %28, %27 : vector<8x128xf32>
    %30 = arith.mulf %24, %29 : vector<8x128xf32>
    %c0_15 = arith.constant 0 : index
    %c0_16 = arith.constant 0 : index
    %31 = vector.load %arg6[%c0_15, %c0_16] : memref<128x128xf32, #tpu.memory_space<vmem>>, vector<128x128xf32>
    %cst_17 = arith.constant dense<0.000000e+00> : vector<8x128xf32>
    %32 = tpu.matmul %30, %31, %cst_17 {dimension_numbers = #tpu.dot_dimension_numbers<[1], [0], [0], [1], [0, 0, 1, 1], [], []>} : vector<8x128xf32>, vector<128x128xf32>, vector<8x128xf32> -> vector<8x128xf32>
    %c0_18 = arith.constant 0 : index
    %c0_19 = arith.constant 0 : index
    %33 = vector.load %arg7[%c0_18, %c0_19] : memref<1x128xf32, #tpu.memory_space<vmem>>, vector<1x128xf32>
    %34 = vector.broadcast %33 : vector<1x128xf32> to vector<8x128xf32>
    %35 = arith.addf %32, %34 : vector<8x128xf32>
    %36 = arith.negf %35 : vector<8x128xf32>
    %37 = math.exp %36 : vector<8x128xf32>
    %cst_20 = arith.constant 1.000000e+00 : f32
    %38 = vector.broadcast %cst_20 : f32 to vector<8x128xf32>
    %39 = arith.addf %38, %37 : vector<8x128xf32>
    %40 = arith.divf %38, %39 : vector<8x128xf32>
    %c0_21 = arith.constant 0 : index
    %c0_22 = arith.constant 0 : index
    %41 = vector.load %arg8[%c0_21, %c0_22] : memref<1x128xf32, #tpu.memory_space<vmem>>, vector<1x128xf32>
    %42 = vector.broadcast %41 : vector<1x128xf32> to vector<8x128xf32>
    %43 = arith.mulf %42, %35 : vector<8x128xf32>
    %c0_23 = arith.constant 0 : index
    %c0_24 = arith.constant 0 : index
    %44 = vector.load %arg9[%c0_23, %c0_24] : memref<1x128xf32, #tpu.memory_space<vmem>>, vector<1x128xf32>
    %45 = vector.broadcast %44 : vector<1x128xf32> to vector<8x128xf32>
    %46 = arith.mulf %45, %40 : vector<8x128xf32>
    %47 = arith.addf %43, %46 : vector<8x128xf32>
    %c0_25 = arith.constant 0 : index
    %c0_26 = arith.constant 0 : index
    %48 = vector.load %arg10[%c0_25, %c0_26] : memref<1x128xf32, #tpu.memory_space<vmem>>, vector<1x128xf32>
    %49 = vector.broadcast %48 : vector<1x128xf32> to vector<8x128xf32>
    %50 = arith.addf %47, %49 : vector<8x128xf32>
    %c0_27 = arith.constant 0 : index
    %c0_28 = arith.constant 0 : index
    %51 = vector.load %arg11[%c0_27, %c0_28] : memref<8x128xf32, #tpu.memory_space<vmem>>, vector<8x128xf32>
    tpu.vector_store %arg11[%c0_27, %c0_28], %50 {strides = array<i32>} : memref<8x128xf32, #tpu.memory_space<vmem>>, vector<8x128xf32>,
    return
  }
  func.func @transform_0(%arg0: i32) -> (i32, i32) {
    %c0_i32 = arith.constant 0 : i32
    %c0_i32_0 = arith.constant 0 : i32
    return %arg0, %c0_i32 : i32, i32
  }
  func.func @transform_1(%arg0: i32) -> (i32, i32) {
    %c0_i32 = arith.constant 0 : i32
    %c0_i32_0 = arith.constant 0 : i32
    %c0_i32_1 = arith.constant 0 : i32
    return %c0_i32, %c0_i32_0 : i32, i32
  }
  func.func @transform_2(%arg0: i32) -> (i32, i32) {
    %c0_i32 = arith.constant 0 : i32
    %c0_i32_0 = arith.constant 0 : i32
    %c0_i32_1 = arith.constant 0 : i32
    return %c0_i32, %c0_i32_0 : i32, i32
  }
  func.func @transform_3(%arg0: i32) -> (i32, i32, i32) {
    %c0_i32 = arith.constant 0 : i32
    %c0_i32_0 = arith.constant 0 : i32
    %c0_i32_1 = arith.constant 0 : i32
    %c0_i32_2 = arith.constant 0 : i32
    return %c0_i32, %c0_i32_0, %c0_i32_1 : i32, i32, i32
  }
  func.func @transform_4(%arg0: i32) -> (i32, i32, i32) {
    %c0_i32 = arith.constant 0 : i32
    %c0_i32_0 = arith.constant 0 : i32
    %c0_i32_1 = arith.constant 0 : i32
    %c0_i32_2 = arith.constant 0 : i32
    return %c0_i32, %c0_i32_0, %c0_i32_1 : i32, i32, i32
  }
  func.func @transform_5(%arg0: i32) -> (i32, i32) {
    %c0_i32 = arith.constant 0 : i32
    %c0_i32_0 = arith.constant 0 : i32
    %c0_i32_1 = arith.constant 0 : i32
    return %c0_i32, %c0_i32_0 : i32, i32
  }
  func.func @transform_6(%arg0: i32) -> (i32, i32) {
    %c0_i32 = arith.constant 0 : i32
    %c0_i32_0 = arith.constant 0 : i32
    %c0_i32_1 = arith.constant 0 : i32
    return %c0_i32, %c0_i32_0 : i32, i32
  }
  func.func @transform_7(%arg0: i32) -> (i32, i32) {
    %c0_i32 = arith.constant 0 : i32
    %c0_i32_0 = arith.constant 0 : i32
    %c0_i32_1 = arith.constant 0 : i32
    return %c0_i32, %c0_i32_0 : i32, i32
  }
  func.func @transform_8(%arg0: i32) -> (i32, i32) {
    %c0_i32 = arith.constant 0 : i32
    %c0_i32_0 = arith.constant 0 : i32
    %c0_i32_1 = arith.constant 0 : i32
    return %c0_i32, %c0_i32_0 : i32, i32
  }
  func.func @transform_9(%arg0: i32) -> (i32, i32) {
    %c0_i32 = arith.constant 0 : i32
    %c0_i32_0 = arith.constant 0 : i32
    %c0_i32_1 = arith.constant 0 : i32
    return %c0_i32, %c0_i32_0 : i32, i32
  }
  func.func @transform_10(%arg0: i32) -> (i32, i32) {
    %c0_i32 = arith.constant 0 : i32
    %c0_i32_0 = arith.constant 0 : i32
    return %arg0, %c0_i32 : i32, i32
  }
}

</mosaic_0001>

<bundles_post_ra>
// kernel: tpu_custom_call.1
= control target key start
LH: loop header
LB: loop body
LE: loop exit
PB: predicated region body
PF: predicated region fallthrough
CT: control target
= control target key end

     0   :  { %15 = vsyncpa [#allocation3], 0  ;;  %s878_s0 = inlined_call_operand.vmem [shape: f32[8,2], index: 0, kind: input, shape index: {}]   ;;  %s879_s1 = inlined_call_operand.vmem [shape: f32[2,128], index: 1, kind: input, shape index: {}]   ;;  %s880_s2 = inlined_call_operand.vmem [shape: f32[1,128], index: 2, kind: input, shape index: {}]   ;;  %s881_s3 = inlined_call_operand.hbm [shape: f32[1,128,128], index: 3, kind: input, shape index: {}]   ;;  %s882_s4 = inlined_call_operand.vmem [shape: f32[1,1,128], index: 4, kind: input, shape index: {}]   ;;  %s883_s5 = inlined_call_operand.hbm [shape: f32[128,128], index: 5, kind: input, shape index: {}]   ;;  %s884_s6 = inlined_call_operand.vmem [shape: f32[1,128], index: 6, kind: input, shape index: {}]   ;;  %s885_s7 = inlined_call_operand.vmem [shape: f32[1,128], index: 7, kind: input, shape index: {}]   ;;  %s886_s8 = inlined_call_operand.vmem [shape: f32[1,128], index: 8, kind: input, shape index: {}]   ;;  %s887_s9 = inlined_call_operand.vmem [shape: f32[1,128], index: 9, kind: input, shape index: {}]   ;;  %s888_s10 = inlined_call_operand.hbm [shape: f32[8,128], index: 10, kind: output, shape index: {}]  }
   0x1   :  { %16 = vsyncpa [#allocation6], 0 }
   0x2   :  { %17 = vsyncpa [#allocation4], 0  ;;  %s707_s13 = smov [#allocation2]   ;;  %s635_s17 = scalar_lea.hbm %s881_s3, 2048 }
   0x3   :  { %s29_s14 = sshll.u32 %s707_s13, 4  ;;  %p636_p0 = scmp.ne.s32.totalorder %s881_s3, %s635_s17  ;;  %s30_s14 = int_to_ptr.vmem [resolvable:$true] %s29_s14 }
   0x4   :  { %p639_p1 = scmp.lt.u32.totalorder %s635_s17, %s881_s3 }
   0x6   :  { %p641_p2 = pnand %p639_p1, %p636_p0 }
   0x8   :  { %644 = shalt.err (!%p641_p2)
}
   0x9   :  { %s645_s22 = scalar_lea.vmem %s30_s14, 2048  ;;  %p650_p4 = scmp.lt.s32.totalorder %s30_s14, %s30_s14 }
   0xa   :  { %p646_p3 = scmp.ne.s32.totalorder %s30_s14, %s645_s22  ;;  %p651_p5 = scmp.lt.s32.totalorder %s645_s22, %s645_s22 }
   0xc   :  { %p652_p6 = por %p651_p5, %p650_p4 }
   0xe   :  { %p653_p7 = pnand %p652_p6, %p646_p3 }
  0x10   :  { %656 = shalt.err (!%p653_p7)
}
  0x11   :  { %s708_s23 = smov 128   ;;  %s709_s24 = smov 8  }
  0x12   :  { %35 = dma.hbm_to_vmem [thread:$0]  %s881_s3, 2048, %s30_s14, [#allocation3], %s708_s23, %s708_s23, %s709_s24  }
  0x13   :  { %s710_s27 = smov [#allocation5]   ;;  %s657_s11 = scalar_lea.hbm %s883_s5, 2048 }
  0x14   :  { %s43_s28 = sshll.u32 %s710_s27, 4  ;;  %p658_p8 = scmp.ne.s32.totalorder %s883_s5, %s657_s11  ;;  %s44_s28 = int_to_ptr.vmem [resolvable:$true] %s43_s28 }
  0x15   :  { %p661_p9 = scmp.lt.u32.totalorder %s657_s11, %s883_s5 }
  0x17   :  { %p663_p10 = pnand %p661_p9, %p658_p8 }
  0x19   :  { %666 = shalt.err (!%p663_p10)
}
  0x1a   :  { %s667_s17 = scalar_lea.vmem %s44_s28, 2048  ;;  %p672_p12 = scmp.lt.s32.totalorder %s44_s28, %s44_s28 }
  0x1b   :  { %p668_p11 = scmp.ne.s32.totalorder %s44_s28, %s667_s17  ;;  %p673_p13 = scmp.lt.s32.totalorder %s667_s17, %s667_s17 }
  0x1d   :  { %p674_p0 = por %p673_p13, %p672_p12 }
  0x1f   :  { %p675_p1 = pnand %p674_p0, %p668_p11 }
  0x21   :  { %678 = shalt.err (!%p675_p1)
}
  0x22   :  { %49 = dma.hbm_to_vmem [thread:$0]  %s883_s5, 2048, %s44_s28, [#allocation6], %s708_s23, %s708_s23, %s709_s24  }
  0x23   :  { %701 = dma.done.wait [#allocation3], 2048  }
  0x24   :  { %702 = vsyncadd [#allocation3], 4294965248 }
  0x25   :  { %703 = dma.done.wait [#allocation6], 2048  }
  0x26   :  { %704 = vsyncadd [#allocation6], 4294965248  ;;  %v711_v0 = vmov 0   ;;  %v64_v1 = vld [vmem:[%s878_s0] sm:$0xff]  ;;  %v712_v2 = vmov 1   ;;  %v199_v3 = vld [vmem:[#allocation2] sm:$0xff] }
  0x27   :  { %623 = vset.pattern.permute.xlu0 %v711_v0  ;;  %v200_v4 = vld [vmem:[#allocation2 + $0x8] sm:$0xff]  ;;  %v201_v5 = vld [vmem:[#allocation2 + $0x10] sm:$0xff]  ;;  %v713_v6 = vmov 0.0|0.0   ;;  %v202_v8 = vld [vmem:[#allocation2 + $0x18] sm:$0xff]  ;;  %vm714_vm0 = vmmov 0   ;;  %v715_v9 = vmov 0.0  }
  0x28   :  { %68 = vperm.xlu0 %623, %v64_v1   ;;  %555 = vmatprep.subr.bf16.mxu0 %v713_v6  ;;  %v556_v7 = vpack.c.bf16 %v200_v4, %v199_v3  ;;  %v559_v10 = vpack.c.bf16 %v202_v8, %v201_v5  ;;  %v203_v11 = vld [vmem:[#allocation2 + $0x20] sm:$0xff]  ;;  %v204_v12 = vld [vmem:[#allocation2 + $0x28] sm:$0xff]  ;;  %v205_v14 = vld [vmem:[#allocation2 + $0x30] sm:$0xff]  ;;  %v716_v57 = vmov 683565275   ;;  %s722_s30 = smov [#allocation7]  }
  0x29   :  { %517 = vmatprep.mubr.msk.f32.mxu0 %vm714_vm0, %v715_v9  ;;  %579 = vmatprep.subr.bf16.mxu1 %v713_v6  ;;  %v562_v13 = vpack.c.bf16 %v204_v12, %v203_v11  ;;  %v206_v15 = vld [vmem:[#allocation2 + $0x38] sm:$0xff]  ;;  %v207_v17 = vld [vmem:[#allocation2 + $0x40] sm:$0xff]  ;;  %v208_v18 = vld [vmem:[#allocation2 + $0x48] sm:$0xff]  ;;  %v717_v59 = vmov 2475754826   ;;  %s428_s11 = sshll.u32 %s722_s30, 4  ;;  %s429_s11 = int_to_ptr.vmem [resolvable:$true] %s428_s11 }
  0x2a   :  { %552 = vmatprep.mubr.msk.f32.mxu1 %vm714_vm0, %v715_v9  ;;  %557 = vmatpush3.bf16.msra.mxu0 %v556_v7  ;;  %v565_v16 = vpack.c.bf16 %v206_v15, %v205_v14  ;;  %v568_v19 = vpack.c.bf16 %v208_v18, %v207_v17  ;;  %v209_v20 = vld [vmem:[#allocation2 + $0x50] sm:$0xff]  ;;  %v210_v21 = vld [vmem:[#allocation2 + $0x58] sm:$0xff]  ;;  %v211_v23 = vld [vmem:[#allocation2 + $0x60] sm:$0xff]  ;;  %v718_v62 = vmov 2131351028   ;;  %s679_s12 = scalar_lea.vmem %s429_s11, 128  ;;  %p684_p3 = scmp.lt.s32.totalorder %s429_s11, %s429_s11 }
  0x2b   :  { %558 = vmatprep.subr.bf16.mxu0 %v713_v6  ;;  %v571_v22 = vpack.c.bf16 %v210_v21, %v209_v20  ;;  %v212_v24 = vld [vmem:[#allocation2 + $0x68] sm:$0xff]  ;;  %v213_v26 = vld [vmem:[#allocation2 + $0x70] sm:$0xff]  ;;  %v214_v27 = vld [vmem:[#allocation2 + $0x78] sm:$0xff]  ;;  %v720_v4 = vmov 920167782   ;;  %p680_p2 = scmp.ne.s32.totalorder %s429_s11, %s679_s12  ;;  %p685_p4 = scmp.lt.s32.totalorder %s679_s12, %s679_s12 }
  0x2c   :  { %624 = vset.pattern.permute.xlu0 %v712_v2  ;;  %v574_v25 = vpack.c.bf16 %v212_v24, %v211_v23  ;;  %v577_v28 = vpack.c.bf16 %v214_v27, %v213_v26  ;;  %v297_v29 = vld [vmem:[#allocation5] sm:$0xff]  ;;  %v298_v30 = vld [vmem:[#allocation5 + $0x8] sm:$0xff]  ;;  %v299_v31 = vld [vmem:[#allocation5 + $0x10] sm:$0xff]  ;;  %v721_v8 = vmov 1326507024  }
  0x2d   :  { %78 = vperm.xlu0 %624, %v64_v1   ;;  %v580_v32 = vpack.c.bf16 %v298_v30, %v297_v29  ;;  %v300_v33 = vld [vmem:[#allocation5 + $0x18] sm:$0xff]  ;;  %v301_v35 = vld [vmem:[#allocation5 + $0x20] sm:$0xff]  ;;  %v302_v36 = vld [vmem:[#allocation5 + $0x28] sm:$0xff]  ;;  %v719_v1 = vmov 2102212464   ;;  %p686_p5 = por %p685_p4, %p684_p3 }
  0x2e   :  { %560 = vmatpush3.bf16.msra.mxu0 %v559_v10  ;;  %v583_v34 = vpack.c.bf16 %v300_v33, %v299_v31  ;;  %v586_v37 = vpack.c.bf16 %v302_v36, %v301_v35  ;;  %v438_v39 = vld [vmem:[%s879_s1] ss:$0 sm:$0xff]  ;;  %v439_v40 = vld [vmem:[%s879_s1 + $0x1] ss:$0 sm:$0xff] }
  0x2f   :  { %561 = vmatprep.subr.bf16.mxu0 %v713_v6  ;;  %581 = vmatpush3.bf16.msra.mxu1 %v580_v32  ;;  %v440_v44 = vld [vmem:[%s880_s2] ss:$0 sm:$0xff]  ;;  %p687_p6 = pnand %p686_p5, %p680_p2 }
  0x30   :  { %582 = vmatprep.subr.bf16.mxu1 %v713_v6 }
  0x32   :  { %563 = vmatpush3.bf16.msra.mxu0 %v562_v13 }
  0x33   :  { %564 = vmatprep.subr.bf16.mxu0 %v713_v6  ;;  %584 = vmatpush3.bf16.msra.mxu1 %v583_v34 }
  0x34   :  { %585 = vmatprep.subr.bf16.mxu1 %v713_v6 }
  0x36   :  { %566 = vmatpush3.bf16.msra.mxu0 %v565_v16 }
  0x37   :  { %567 = vmatprep.subr.bf16.mxu0 %v713_v6  ;;  %587 = vmatpush3.bf16.msra.mxu1 %v586_v37 }
  0x38   :  { %588 = vmatprep.subr.bf16.mxu1 %v713_v6 }
  0x3a   :  { %569 = vmatpush3.bf16.msra.mxu0 %v568_v19 }
  0x3b   :  { %570 = vmatprep.subr.bf16.mxu0 %v713_v6 }
  0x3e   :  { %572 = vmatpush3.bf16.msra.mxu0 %v571_v22 }
  0x3f   :  { %573 = vmatprep.subr.bf16.mxu0 %v713_v6 }
  0x42   :  { %575 = vmatpush3.bf16.msra.mxu0 %v574_v25 }
  0x43   :  { %576 = vmatprep.subr.bf16.mxu0 %v713_v6 }
  0x46   :  { %578 = vmatpush3.bf16.msra.mxu0 %v577_v28 }
  0xa7   :  { %v69_v38 = vpop.permute.xlu0 %68 }
  0xa8   :  { %v75_v42 = vmul.f32 %v438_v39, %v69_v38 }
  0xac   :  { %v79_v41 = vpop.permute.xlu0 %78 }
  0xad   :  { %v85_v43 = vmul.f32 %v439_v40, %v79_v41 }
  0xaf   :  { %v86_v45 = vadd.f32 %v85_v43, %v75_v42 }
  0xb1   :  { %v826_v46 = vadd.f32 %v440_v44, %v86_v45 }
  0xb3   :  { %v98_v47 = vand.u32 2139095040, %v826_v46  ;;  %v95_v51 = vand.u32 2147483647, %v826_v46  ;;  %vm97_vm8 = vcmp.lt.s32.totalorder %v826_v46, 0  ;;  %vm187_vm13 = vweird.f32 %v826_v46 }
  0xb5   :  { %v99_v48 = vshrl.u32 %v98_v47, 23  ;;  %v102_v55 = vand.u32 8388607, %v95_v51  ;;  %vm96_vm9 = vcmp.le.f32.partialorder %v95_v51, 0.7853982 }
  0xb7   :  { %v441_v49 = vadd.s32 4294967169, %v99_v48  ;;  %v103_v10 = vor.u32 8388608, %v102_v55 }
  0xb9   :  { %v105_v50 = vadd.s32 1, %v441_v49  ;;  %v143_v24 = vshll.u32 %v103_v10, 8 }
  0xbb   :  { %vm106_vm1 = vcmp.gt.s32.totalorder %v105_v50, 0 }
  0xbc   :  { %v107_v52 = vsel %vm106_vm1, %v105_v50, 0 }
  0xbd   :  { %v109_v53 = vand.u32 31, %v107_v52  ;;  %v108_v56 = vshrl.u32 %v107_v52, 5 }
  0xbf   :  { %v110_v54 = vsub.s32 32, %v109_v53  ;;  %v112_v58 = vshll.u32 %v716_v57, %v109_v53  ;;  %v115_v60 = vshll.u32 %v717_v59, %v109_v53  ;;  %v118_v0 = vshll.u32 %v718_v62, %v109_v53 }
  0xc0   :  { %v121_v3 = vshll.u32 %v719_v1, %v109_v53  ;;  %v124_v7 = vshll.u32 %v720_v4, %v109_v53  ;;  %vm127_vm2 = vcmp.lt.s32.totalorder %v108_v56, 1  ;;  %vm130_vm3 = vcmp.lt.s32.totalorder %v108_v56, 4 }
  0xc1   :  { %v113_v61 = vshrl.u32 %v717_v59, %v110_v54  ;;  %v116_v63 = vshrl.u32 %v718_v62, %v110_v54  ;;  %v119_v2 = vshrl.u32 %v719_v1, %v110_v54  ;;  %v122_v5 = vshrl.u32 %v720_v4, %v110_v54 }
  0xc2   :  { %v125_v9 = vshrl.u32 %v721_v8, %v110_v54  ;;  %v111_v19 = vshrl.u32 %v716_v57, %v110_v54  ;;  %vm129_vm4 = vcmp.lt.s32.totalorder %v108_v56, 3  ;;  %vm128_vm5 = vcmp.lt.s32.totalorder %v108_v56, 2 }
  0xc3   :  { %v114_v11 = vor.u32 %v113_v61, %v112_v58  ;;  %v117_v12 = vor.u32 %v116_v63, %v115_v60  ;;  %v120_v13 = vor.u32 %v119_v2, %v118_v0  ;;  %v123_v14 = vor.u32 %v122_v5, %v121_v3 }
  0xc4   :  { %v126_v15 = vor.u32 %v125_v9, %v124_v7 }
  0xc5   :  { %v132_v16 = vsel %vm130_vm3, %v120_v13, 2102212464  ;;  %v135_v17 = vsel %vm127_vm2, %v114_v11, %v117_v12  ;;  %v139_v18 = vsel %vm127_vm2, %v117_v12, %v120_v13  ;;  %v136_v20 = vsel %vm130_vm3, %v123_v14, 920167782 }
  0xc6   :  { %v140_v21 = vsel %vm130_vm3, %v126_v15, 1326507024  ;;  %v137_v22 = vsel %vm129_vm4, %v120_v13, %v136_v20  ;;  %v131_v25 = vsel %vm127_vm2, %v111_v19, %v114_v11  ;;  %v133_v26 = vsel %vm129_vm4, %v117_v12, %v132_v16  ;;  %v303_v13 = vld [vmem:[#allocation5 + $0x30] sm:$0xff]  ;;  %v305_v16 = vld [vmem:[#allocation5 + $0x40] sm:$0xff]  ;;  %v308_v20 = vld [vmem:[#allocation5 + $0x58] sm:$0xff] }
  0xc7   :  { %v141_v23 = vsel %vm129_vm4, %v123_v14, %v140_v21  ;;  %v138_v27 = vsel %vm128_vm5, %v135_v17, %v137_v22  ;;  %v134_v33 = vsel %vm128_vm5, %v131_v25, %v133_v26  ;;  %v304_v14 = vld [vmem:[#allocation5 + $0x38] sm:$0xff]  ;;  %v306_v17 = vld [vmem:[#allocation5 + $0x48] sm:$0xff]  ;;  %v307_v19 = vld [vmem:[#allocation5 + $0x50] sm:$0xff] }
  0xc8   :  { %v142_v28 = vsel %vm128_vm5, %v139_v18, %v141_v23  ;;  %v835_v31 = vmul.u32.u64.low %v143_v24, %v138_v27  ;;  %v836_v32 = vmul.u32.u64.high %v143_v24, %v138_v27, %v835_v31  ;;  %v150_v35 = vmul.u32 %v143_v24, %v134_v33  ;;  %v310_v22 = vld [vmem:[#allocation5 + $0x68] sm:$0xff]  ;;  %v312_v25 = vld [vmem:[#allocation5 + $0x78] sm:$0xff]  ;;  %v445_v27 = vld [vmem:[%s882_s4] ss:$0 sm:$0xff] }
  0xc9   :  { %v832_v29 = vmul.u32.u64.low %v143_v24, %v142_v28  ;;  %v833_v30 = vmul.u32.u64.high %v143_v24, %v142_v28, %v832_v29  ;;  %v589_v15 = vpack.c.bf16 %v304_v14, %v303_v13  ;;  %v592_v18 = vpack.c.bf16 %v306_v17, %v305_v16  ;;  %v311_v24 = vld [vmem:[#allocation5 + $0x70] sm:$0xff] }
  0xca   :  { %v153_v34 = vadd.s32 1, %v836_v32  ;;  %v595_v21 = vpack.c.bf16 %v308_v20, %v307_v19  ;;  %v601_v26 = vpack.c.bf16 %v312_v25, %v311_v24 }
  0xcb   :  { %vm152_vm6 = vc.u32 %v833_v30, %v835_v31  ;;  %v151_v48 = vadd.s32 %v835_v31, %v833_v30  ;;  %590 = vmatpush3.bf16.msra.mxu1 %v589_v15 }
  0xcc   :  { %v154_v36 = vsel %vm152_vm6, %v153_v34, %v836_v32  ;;  %591 = vmatprep.subr.bf16.mxu1 %v713_v6 }
  0xcd   :  { %v155_v37 = vadd.s32 %v154_v36, %v150_v35 }
  0xcf   :  { %v156_v38 = vadd.s32 536870912, %v155_v37  ;;  %593 = vmatpush3.bf16.msra.mxu1 %v592_v18 }
  0xd0   :  { %594 = vmatprep.subr.bf16.mxu1 %v713_v6 }
  0xd1   :  { %v157_v39 = vshrl.u32 %v156_v38, 30 }
  0xd3   :  { %v158_v40 = vshll.u32 %v157_v39, 30  ;;  %v181_v61 = vsub.s32 4, %v157_v39  ;;  %596 = vmatpush3.bf16.msra.mxu1 %v595_v21 }
  0xd4   :  { %597 = vmatprep.subr.bf16.mxu1 %v713_v6 }
  0xd5   :  { %v159_v41 = vsub.s32 %v155_v37, %v158_v40  ;;  %v182_v0 = vsel %vm97_vm8, %v181_v61, %v157_v39 }
  0xd6   :  { %v184_v2 = vsel %vm96_vm9, 0, %v182_v0 }
  0xd7   :  { %v161_v42 = vsub.s32 0, %v159_v41  ;;  %v188_v3 = vadd.s32 3, %v184_v2 }
  0xd9   :  { %v442_v43 = vmin.u32 %v161_v42, %v159_v41  ;;  %v189_v4 = vand.u32 3, %v188_v3  ;;  %v448_v42 = vld [vmem:[%s885_s7] ss:$0 sm:$0xff] }
  0xdb   :  { %v163_v44 = vclz %v442_v43  ;;  %vm194_vm10 = vcmp.eq.s32.totalorder %v189_v4, 2  ;;  %vm191_vm11 = vcmp.eq.s32.totalorder %v189_v4, 0  ;;  %vm190_vm12 = vcmp.lt.s32.totalorder %v189_v4, 2  ;;  %v449_v43 = vld [vmem:[%s886_s8] ss:$0 sm:$0xff] }
  0xdd   :  { %v443_v45 = vadd.s32 4294967294, %v163_v44 }
  0xdf   :  { %vm444_vm7 = vcmp.lt.s32.totalorder %v443_v45, 0 }
  0xe0   :  { %v166_v47 = vsel %vm444_vm7, 0, %v443_v45 }
  0xe1   :  { %v167_v49 = vsub.s32 32, %v166_v47  ;;  %v171_v50 = vsub.s32 4294967266, %v166_v47  ;;  %v168_v52 = vshll.u32 %v159_v41, %v166_v47 }
  0xe3   :  { %v169_v53 = vshrl.u32 %v151_v48, %v167_v49  ;;  %v172_v54 = vadd.s32 127, %v171_v50  ;;  %v450_v48 = vld [vmem:[%s887_s9] ss:$0 sm:$0xff] }
  0xe5   :  { %v170_v55 = vor.u32 %v169_v53, %v168_v52  ;;  %v173_v56 = vshll.u32 %v172_v54, 23 }
  0xe7   :  { %v174_v57 = vor.u32 4788187, %v173_v56  ;;  %v177_v59 = vcvt.s32.f32 %v170_v55 }
  0xe9   :  { %v175_v58 = vand.u32 2147483647, %v174_v57 }
  0xeb   :  { %v178_v60 = vmul.f32 %v177_v59, %v175_v58 }
  0xed   :  { %v179_v62 = vxor.u32 2147483648, %v178_v60 }
  0xef   :  { %v180_v63 = vsel %vm97_vm8, %v179_v62, %v178_v60 }
  0xf0   :  { %v183_v1 = vsel %vm96_vm9, %v826_v46, %v180_v63  ;;  %v309_v46 = vld [vmem:[#allocation5 + $0x60] sm:$0xff] }
  0xf1   :  { %625 = vcosq.f32 %v183_v1  ;;  %v598_v23 = vpack.c.bf16 %v310_v22, %v309_v46 }
  0xf2   :  { %627 = vsinq.f32 %v183_v1 }
  0xf3   :  { %599 = vmatpush3.bf16.msra.mxu1 %v598_v23 }
  0xf4   :  { %600 = vmatprep.subr.bf16.mxu1 %v713_v6  ;;  %v446_v6 = vld [vmem:[%s884_s6] ss:$0 sm:$0xff] }
  0xf7   :  { %602 = vmatpush3.bf16.msra.mxu1 %v601_v26 }
  0xfb   :  { %v626_v5 = vpop.eup %625 }
  0xfc   :  { %v628_v7 = vpop.eup %627  ;;  %v195_v8 = vxor.u32 2147483648, %v626_v5 }
  0xfd   :  { %v192_v9 = vxor.u32 2147483648, %v628_v7 }
  0xfe   :  { %v196_v10 = vsel %vm194_vm10, %v195_v8, %v628_v7 }
  0xff   :  { %v193_v11 = vsel %vm191_vm11, %v626_v5, %v192_v9 }
 0x100   :  { %v197_v51 = vsel %vm190_vm12, %v193_v11, %v196_v10 }
 0x101   :  { %v198_v12 = vsel %vm187_vm13, nan, %v197_v51 }
 0x102   :  { %518 = vmatmul.mubr.f32.vlgmr.msra.gmra.mrb[0].mxu0 %v198_v12 }
 0x1d5   :  { %v288_v28 = vpop.f32.mrb[0].mxu0 }
 0x1d6   :  { %v289_v29 = vadd.f32 %v445_v27, %v288_v28  ;;  %v519_v30 = vpop.f32.mrb[1].mxu0 }
 0x1d8   :  { %v293_v31 = vmul.f32 0.70710677, %v289_v29  ;;  %v292_v33 = vmul.f32 0.5, %v289_v29 }
 0x1da   :  { %629 = verf.f32 %v293_v31 }
 0x1e4   :  { %v630_v32 = vpop.eup %629 }
 0x1e5   :  { %v295_v34 = vadd.f32 1.0, %v630_v32 }
 0x1e7   :  { %v296_v35 = vmul.f32 %v295_v34, %v292_v33 }
 0x1e9   :  { %553 = vmatmul.mubr.f32.vlgmr.msra.gmra.mrb[0].mxu1 %v296_v35 }
 0x2bc   :  { %v386_v36 = vpop.f32.mrb[0].mxu1 }
 0x2bd   :  { %v387_v37 = vadd.f32 %v446_v6, %v386_v36  ;;  %v554_v38 = vpop.f32.mrb[1].mxu1 }
 0x2bf   :  { %v447_v39 = vmul.f32 -1.442695, %v387_v37  ;;  %v403_v45 = vmul.f32 %v448_v42, %v387_v37 }
 0x2c1   :  { %631 = vpow2.f32 %v447_v39 }
 0x2cb   :  { %v632_v40 = vpop.eup %631 }
 0x2cc   :  { %v393_v41 = vadd.f32 1.0, %v632_v40 }
 0x2ce   :  { %633 = vrcp.f32 %v393_v41 }
 0x2d8   :  { %v634_v44 = vpop.eup %633 }
 0x2d9   :  { %v411_v47 = vmul.f32 %v634_v44, %v449_v43 }
 0x2db   :  { %v412_v49 = vadd.f32 %v411_v47, %v403_v45 }
 0x2dd   :  { %v420_v50 = vadd.f32 %v450_v48, %v412_v49 }
 0x2df   :  { %421 = vst [vmem:[#allocation7] sm:$0xff] %v420_v50 }
 0x2e0   :  { %690 = shalt.err (!%p687_p6)
}
 0x2e1   :  { %s691_s13 = scalar_lea.hbm %s888_s10, 128 }
 0x2e2   :  { %p692_p7 = scmp.ne.s32.totalorder %s888_s10, %s691_s13  ;;  %p695_p8 = scmp.lt.u32.totalorder %s691_s13, %s888_s10 }
 0x2e4   :  { %p697_p9 = pnand %p695_p8, %p692_p7 }
 0x2e6   :  { %700 = shalt.err (!%p697_p9)
}
 0x2e7   :  { %431 = dma.vmem_to_hbm [thread:$0]  %s429_s11, 128, %s888_s10, [#allocation4]  }
 0x2e8   :  { %705 = dma.done.wait [#allocation4], 128  }
 0x2e9   :  { %706 = vsyncadd [#allocation4], 4294967168 }
 0x2ea   :  { %435 = vsyncpa [#allocation3], 1 }
 0x2eb   :  { %436 = vsyncpa [#allocation6], 1 }
 0x2ec   :  { %437 = vsyncpa [#allocation4], 1 }

</bundles_post_ra>
